<compile_context>
chip_gen: v5e
topology: v5e:2x2
jax: 0.10.0
libtpu: 0.0.40
codegen_flags: <defaults>
</compile_context>

<pallas_src>
import jax
import jax.numpy as jnp
from jax.experimental import pallas as pl
from jax.experimental.pallas import tpu as pltpu

EPS = 1e-5  # nn.BatchNorm1d default eps


def _round_up(x, m):
    return (x + m - 1) // m * m


def _physical_vmem_bytes():
    try:
        return int(pltpu.get_tpu_info().vmem_capacity_bytes)
    except Exception:
        return 64 * 1024 * 1024  # conservative: v7x per-TensorCore VMEM


def _late_fusion_kernel(x_ref, w1_ref, b1_ref, w2_ref, b2_ref, out_ref):
    # h = relu(x @ W1 + b1), W1 block-diagonal = [[w_text, 0], [0, w_image]]
    h = jnp.dot(x_ref[...], w1_ref[...], preferred_element_type=jnp.float32)
    h = jnp.maximum(h + b1_ref[...], 0.0)
    # out = h @ W2 + b2 (eval-mode BatchNorm already folded into W2/b2 in the wrapper)
    out = jnp.dot(h.astype(w2_ref.dtype), w2_ref[...],
                  preferred_element_type=jnp.float32)
    out_ref[...] = (out + b2_ref[...]).astype(out_ref.dtype)


def late_fusion_forward(text, image, params, *, tile_b=512,
                        compute_dtype=jnp.bfloat16):
    """Fused LateFusionModel eval-mode forward as one batch-tiled Pallas kernel."""
    B, Dt = text.shape
    _, Di = image.shape
    Ht = params["w_text"].shape[1]
    Hi = params["w_image"].shape[1]
    O = params["w2_text"].shape[1]
    D = Dt + Di
    H = Ht + Hi
    f32 = jnp.float32

    # --- fold eval-mode BatchNorm1d into fc2 (wrapper-side constant folding) ---
    # BN(x) = s*x + c with s = gamma*rsqrt(var+eps), c = beta - mean*s
    s_t = params["bn_t_gamma"] * jax.lax.rsqrt(params["bn_t_var"] + EPS)   # (1, Ht)
    c_t = params["bn_t_beta"] - params["bn_t_mean"] * s_t
    s_i = params["bn_i_gamma"] * jax.lax.rsqrt(params["bn_i_var"] + EPS)   # (1, Hi)
    c_i = params["bn_i_beta"] - params["bn_i_mean"] * s_i

    w2 = jnp.concatenate([s_t.reshape(-1, 1) * params["w2_text"],
                          s_i.reshape(-1, 1) * params["w2_image"]], axis=0)   # (H, O)
    b2 = params["b2"] + c_t @ params["w2_text"] + c_i @ params["w2_image"]    # (1, O)

    # --- block-diagonal first layer (fuses the two branch matmuls into one) ---
    w1 = jnp.zeros((D, H), f32)
    w1 = w1.at[:Dt, :Ht].set(params["w_text"])
    w1 = w1.at[Dt:, Ht:].set(params["w_image"])
    b1 = jnp.concatenate([params["b_text"], params["b_image"]], axis=1)       # (1, H)

    # --- output lane handling: only pad when O is large enough to be worth it ---
    o_out = _round_up(O, 128) if O >= 64 else O
    if o_out != O:
        w2 = jnp.pad(w2, ((0, 0), (0, o_out - O)))
        b2 = jnp.pad(b2, ((0, 0), (0, o_out - O)))

    # --- single fused input stream ---
    x = jnp.concatenate([text, image], axis=1)                                # (B, D)

    in_itemsize = jnp.dtype(compute_dtype).itemsize
    param_bytes = (D * H + H * o_out) * in_itemsize + (H + o_out) * 4

    def block_bytes(tb):
        # double-buffered activation/output tiles + single-buffered resident params
        return 2 * tb * D * in_itemsize + 2 * tb * o_out * 4 + param_bytes

    # --- tile_b selection: biggest batch tile that fits comfortably in VMEM ---
    phys_vmem = _physical_vmem_bytes()
    tile_b = max(16, _round_up(min(int(tile_b), _round_up(B, 16)), 16))
    while tile_b > 16 and block_bytes(tile_b) > int(0.45 * phys_vmem):
        tile_b = max(16, _round_up(tile_b // 2, 16))

    b_pad = _round_up(B, tile_b)
    if b_pad != B:
        x = jnp.pad(x, ((0, b_pad - B), (0, 0)))
    grid = (b_pad // tile_b,)

    # MXU operands in compute_dtype (bf16 default: halves streamed HBM bytes, native MXU);
    # biases and the whole epilogue stay f32, accumulation is f32.
    x_c = x.astype(compute_dtype)
    w1_c = w1.astype(compute_dtype)
    w2_c = w2.astype(compute_dtype)
    b1_f = b1.astype(f32)
    b2_f = b2.astype(f32)

    cost = pl.CostEstimate(
        flops=2 * b_pad * (D * H + H * o_out),
        transcendentals=0,
        bytes_accessed=(b_pad * D * in_itemsize     # streamed activations in
                        + param_bytes               # resident weights/biases
                        + b_pad * o_out * 4),       # output writeback
    )

    # VMEM budget: 2x headroom over the estimate, capped by the generation's physical VMEM.
    vmem_limit = int(min(int(0.85 * phys_vmem),
                         max(4 * 1024 * 1024, 2 * block_bytes(tile_b))))

    def _build_call(resident_single_buffered):
        res_kwargs = ({"pipeline_mode": pl.Buffered(1)}
                      if resident_single_buffered else {})
        in_specs = [
            pl.BlockSpec((tile_b, D), lambda i: (i, 0)),                 # x tile (streamed)
            pl.BlockSpec((D, H), lambda i: (0, 0), **res_kwargs),        # W1 (resident)
            pl.BlockSpec((1, H), lambda i: (0, 0), **res_kwargs),        # b1 (resident)
            pl.BlockSpec((H, o_out), lambda i: (0, 0), **res_kwargs),    # W2 (BN folded)
            pl.BlockSpec((1, o_out), lambda i: (0, 0), **res_kwargs),    # b2 (BN folded)
        ]
        out_spec = pl.BlockSpec((tile_b, o_out), lambda i: (i, 0))
        return pl.pallas_call(
            _late_fusion_kernel,
            out_shape=jax.ShapeDtypeStruct((b_pad, o_out), jnp.float32),
            grid=grid,
            in_specs=in_specs,
            out_specs=out_spec,
            compiler_params=pltpu.CompilerParams(
                dimension_semantics=("parallel",),   # batch tiles shard across TCs on v7x
                vmem_limit_bytes=vmem_limit,
            ),
            cost_estimate=cost,
        )

    args = (x_c, w1_c, b1_f, w2_c, b2_f)
    try:
        out = _build_call(True)(*args)
    except Exception:
        # Fallback if single-buffered resident params (pl.Buffered(1)) is unsupported
        # by this Pallas build; semantics are identical, only VMEM footprint differs.
        out = _build_call(False)(*args)

    return out[:B, :O]


def init_params(key, text_in, image_in, hidden_text, hidden_image, out_size):
    """Deterministic synthetic parameters (shapes match the PyTorch module)."""
    keys = jax.random.split(key, 8)

    def lin(kw, kb, fan_in, fan_out):
        bound = 1.0 / jnp.sqrt(fan_in)
        w = jax.random.uniform(kw, (fan_in, fan_out), jnp.float32, -bound, bound)
        b = jax.random.uniform(kb, (1, fan_out), jnp.float32, -bound, bound)
        return w, b

    w_text, b_text = lin(keys[0], keys[1], text_in, hidden_text)
    w_image, b_image = lin(keys[2], keys[3], image_in, hidden_image)
    w2, b2 = lin(keys[4], keys[5], hidden_text + hidden_image, out_size)

    # BatchNorm1d: non-default running stats so the BN actually does something.
    bn_t_mean = 0.05 * jnp.arange(hidden_text, dtype=jnp.float32).reshape(1, -1)
    bn_t_var = 1.0 + 0.01 * jnp.arange(hidden_text, dtype=jnp.float32).reshape(1, -1)
    bn_i_mean = 0.03 * jnp.arange(hidden_image, dtype=jnp.float32).reshape(1, -1)
    bn_i_var = 1.0 + 0.02 * jnp.arange(hidden_image, dtype=jnp.float32).reshape(1, -1)
    bn_t_gamma = jnp.ones((1, hidden_text), jnp.float32)
    bn_t_beta = jnp.zeros((1, hidden_text), jnp.float32)
    bn_i_gamma = jnp.ones((1, hidden_image), jnp.float32)
    bn_i_beta = jnp.zeros((1, hidden_image), jnp.float32)

    return {
        "w_text": w_text, "b_text": b_text,
        "bn_t_gamma": bn_t_gamma, "bn_t_beta": bn_t_beta,
        "bn_t_mean": bn_t_mean, "bn_t_var": bn_t_var,
        "w_image": w_image, "b_image": b_image,
        "bn_i_gamma": bn_i_gamma, "bn_i_beta": bn_i_beta,
        "bn_i_mean": bn_i_mean, "bn_i_var": bn_i_var,
        # fc2 weight kept split in the param dict (mirrors concat semantics);
        # the wrapper re-fuses (and BN-folds) it into one [Ht+Hi, O] weight.
        "w2_text": w2[:hidden_text, :],
        "w2_image": w2[hidden_text:, :],
        "b2": b2,
    }


def reference_forward(text, image, p):
    """Plain-JAX reference mirroring PyTorch eval-mode forward (no folding)."""
    t = jnp.maximum(text @ p["w_text"] + p["b_text"], 0.0)
    t = (t - p["bn_t_mean"]) / jnp.sqrt(p["bn_t_var"] + EPS) * p["bn_t_gamma"] + p["bn_t_beta"]
    im = jnp.maximum(image @ p["w_image"] + p["b_image"], 0.0)
    im = (im - p["bn_i_mean"]) / jnp.sqrt(p["bn_i_var"] + EPS) * p["bn_i_gamma"] + p["bn_i_beta"]
    x = jnp.concatenate([t, im], axis=1)
    w2 = jnp.concatenate([p["w2_text"], p["w2_image"]], axis=0)
    return x @ w2 + p["b2"]


if __name__ == "__main__":
    B, TEXT_IN, IMAGE_IN = 8, 32, 24
    HIDDEN_TEXT, HIDDEN_IMAGE, OUT = 64, 64, 8

    key = jax.random.PRNGKey(0)
    k_text, k_image, k_params = jax.random.split(key, 3)

    text = jax.random.normal(k_text, (B, TEXT_IN), jnp.float32)
    image = jax.random.normal(k_image, (B, IMAGE_IN), jnp.float32)
    params = init_params(k_params, TEXT_IN, IMAGE_IN, HIDDEN_TEXT, HIDDEN_IMAGE, OUT)

    ref = reference_forward(text, image, params)

    # f32 path: strict correctness check against the eval-mode reference.
    out_f32 = late_fusion_forward(text, image, params, compute_dtype=jnp.float32)
    out_f32 = jax.block_until_ready(out_f32)
    assert out_f32.shape == (B, OUT)
    assert jnp.allclose(out_f32, ref, atol=1e-4, rtol=1e-4), "f32 mismatch vs reference"

    # Default bf16-streamed path (HBM-bound fast path): loose tolerance check.
    out_bf16 = late_fusion_forward(text, image, params)
    out_bf16 = jax.block_until_ready(out_bf16)
    assert out_bf16.shape == (B, OUT)
    assert jnp.allclose(out_bf16, ref, atol=1e-1, rtol=1e-1), "bf16 mismatch vs reference"

    print("KERNEL_OK")
</pallas_src>

<mosaic_0001>
module attributes {stable_mosaic.version = 11 : i64} {
  func.func @_late_fusion_kernel(%arg0: i32, %arg1: memref<16x56xf32, #tpu.memory_space<vmem>>, %arg2: memref<56x128xf32, #tpu.memory_space<vmem>>, %arg3: memref<1x128xf32, #tpu.memory_space<vmem>>, %arg4: memref<128x8xf32, #tpu.memory_space<vmem>>, %arg5: memref<1x8xf32, #tpu.memory_space<vmem>>, %arg6: memref<16x8xf32, #tpu.memory_space<vmem>>) attributes {dimension_semantics = [#tpu.dimension_semantics<parallel>], iteration_bounds = array<i64: 1>, scalar_prefetch = 0 : i64, scratch_operands = 0 : i64, tpu.core_type = #tpu.core_type<tc>, window_params = [{transform_indices = @transform_0, window_bounds = array<i64: 16, 56>}, {pipeline_mode = #tpu.pipeline_mode<synchronous>, transform_indices = @transform_1, window_bounds = array<i64: 56, 128>}, {pipeline_mode = #tpu.pipeline_mode<synchronous>, transform_indices = @transform_2, window_bounds = array<i64: 1, 128>}, {pipeline_mode = #tpu.pipeline_mode<synchronous>, transform_indices = @transform_3, window_bounds = array<i64: 128, 8>}, {pipeline_mode = #tpu.pipeline_mode<synchronous>, transform_indices = @transform_4, window_bounds = array<i64: 1, 8>}, {transform_indices = @transform_5, window_bounds = array<i64: 16, 8>}]} {
    %c0 = arith.constant 0 : index
    %c0_0 = arith.constant 0 : index
    %0 = vector.load %arg1[%c0, %c0_0] : memref<16x56xf32, #tpu.memory_space<vmem>>, vector<16x56xf32>
    %c0_1 = arith.constant 0 : index
    %c0_2 = arith.constant 0 : index
    %1 = vector.load %arg2[%c0_1, %c0_2] : memref<56x128xf32, #tpu.memory_space<vmem>>, vector<56x128xf32>
    %cst = arith.constant dense<0.000000e+00> : vector<16x128xf32>
    %2 = tpu.matmul %0, %1, %cst {dimension_numbers = #tpu.dot_dimension_numbers<[1], [0], [0], [1], [0, 0, 1, 1], [], []>} : vector<16x56xf32>, vector<56x128xf32>, vector<16x128xf32> -> vector<16x128xf32>
    %c0_3 = arith.constant 0 : index
    %c0_4 = arith.constant 0 : index
    %3 = vector.load %arg3[%c0_3, %c0_4] : memref<1x128xf32, #tpu.memory_space<vmem>>, vector<1x128xf32>
    %4 = vector.broadcast %3 : vector<1x128xf32> to vector<16x128xf32>
    %5 = arith.addf %2, %4 : vector<16x128xf32>
    %cst_5 = arith.constant 0.000000e+00 : f32
    %6 = vector.broadcast %cst_5 : f32 to vector<16x128xf32>
    %7 = arith.maximumf %5, %6 : vector<16x128xf32>
    %c0_6 = arith.constant 0 : index
    %c0_7 = arith.constant 0 : index
    %8 = vector.load %arg4[%c0_6, %c0_7] : memref<128x8xf32, #tpu.memory_space<vmem>>, vector<128x8xf32>
    %cst_8 = arith.constant dense<0.000000e+00> : vector<16x8xf32>
    %9 = tpu.matmul %7, %8, %cst_8 {dimension_numbers = #tpu.dot_dimension_numbers<[1], [0], [0], [1], [0, 0, 1, 1], [], []>} : vector<16x128xf32>, vector<128x8xf32>, vector<16x8xf32> -> vector<16x8xf32>
    %c0_9 = arith.constant 0 : index
    %c0_10 = arith.constant 0 : index
    %10 = vector.load %arg5[%c0_9, %c0_10] : memref<1x8xf32, #tpu.memory_space<vmem>>, vector<1x8xf32>
    %11 = vector.broadcast %10 : vector<1x8xf32> to vector<16x8xf32>
    %12 = arith.addf %9, %11 : vector<16x8xf32>
    %c0_11 = arith.constant 0 : index
    %c0_12 = arith.constant 0 : index
    %13 = vector.load %arg6[%c0_11, %c0_12] : memref<16x8xf32, #tpu.memory_space<vmem>>, vector<16x8xf32>
    tpu.vector_store %arg6[%c0_11, %c0_12], %12 {strides = array<i32>} : memref<16x8xf32, #tpu.memory_space<vmem>>, vector<16x8xf32>,
    return
  }
  func.func @transform_0(%arg0: i32) -> (i32, i32) {
    %c0_i32 = arith.constant 0 : i32
    %c0_i32_0 = arith.constant 0 : i32
    return %arg0, %c0_i32 : i32, i32
  }
  func.func @transform_1(%arg0: i32) -> (i32, i32) {
    %c0_i32 = arith.constant 0 : i32
    %c0_i32_0 = arith.constant 0 : i32
    %c0_i32_1 = arith.constant 0 : i32
    return %c0_i32, %c0_i32_0 : i32, i32
  }
  func.func @transform_2(%arg0: i32) -> (i32, i32) {
    %c0_i32 = arith.constant 0 : i32
    %c0_i32_0 = arith.constant 0 : i32
    %c0_i32_1 = arith.constant 0 : i32
    return %c0_i32, %c0_i32_0 : i32, i32
  }
  func.func @transform_3(%arg0: i32) -> (i32, i32) {
    %c0_i32 = arith.constant 0 : i32
    %c0_i32_0 = arith.constant 0 : i32
    %c0_i32_1 = arith.constant 0 : i32
    return %c0_i32, %c0_i32_0 : i32, i32
  }
  func.func @transform_4(%arg0: i32) -> (i32, i32) {
    %c0_i32 = arith.constant 0 : i32
    %c0_i32_0 = arith.constant 0 : i32
    %c0_i32_1 = arith.constant 0 : i32
    return %c0_i32, %c0_i32_0 : i32, i32
  }
  func.func @transform_5(%arg0: i32) -> (i32, i32) {
    %c0_i32 = arith.constant 0 : i32
    %c0_i32_0 = arith.constant 0 : i32
    return %arg0, %c0_i32 : i32, i32
  }
}

module attributes {stable_mosaic.version = 11 : i64} {
  func.func @_late_fusion_kernel(%arg0: i32, %arg1: memref<16x56xf32, #tpu.memory_space<vmem>>, %arg2: memref<56x128xf32, #tpu.memory_space<vmem>>, %arg3: memref<1x128xf32, #tpu.memory_space<vmem>>, %arg4: memref<128x8xf32, #tpu.memory_space<vmem>>, %arg5: memref<1x8xf32, #tpu.memory_space<vmem>>, %arg6: memref<16x8xf32, #tpu.memory_space<vmem>>) attributes {dimension_semantics = [#tpu.dimension_semantics<parallel>], iteration_bounds = array<i64: 1>, scalar_prefetch = 0 : i64, scratch_operands = 0 : i64, tpu.core_type = #tpu.core_type<tc>, window_params = [{transform_indices = @transform_0, window_bounds = array<i64: 16, 56>}, {pipeline_mode = #tpu.pipeline_mode<synchronous>, transform_indices = @transform_1, window_bounds = array<i64: 56, 128>}, {pipeline_mode = #tpu.pipeline_mode<synchronous>, transform_indices = @transform_2, window_bounds = array<i64: 1, 128>}, {pipeline_mode = #tpu.pipeline_mode<synchronous>, transform_indices = @transform_3, window_bounds = array<i64: 128, 8>}, {pipeline_mode = #tpu.pipeline_mode<synchronous>, transform_indices = @transform_4, window_bounds = array<i64: 1, 8>}, {transform_indices = @transform_5, window_bounds = array<i64: 16, 8>}]} {
    %c0 = arith.constant 0 : index
    %c0_0 = arith.constant 0 : index
    %0 = vector.load %arg1[%c0, %c0_0] : memref<16x56xf32, #tpu.memory_space<vmem>>, vector<16x56xf32>
    %c0_1 = arith.constant 0 : index
    %c0_2 = arith.constant 0 : index
    %1 = vector.load %arg2[%c0_1, %c0_2] : memref<56x128xf32, #tpu.memory_space<vmem>>, vector<56x128xf32>
    %cst = arith.constant dense<0.000000e+00> : vector<16x128xf32>
    %2 = tpu.matmul %0, %1, %cst {dimension_numbers = #tpu.dot_dimension_numbers<[1], [0], [0], [1], [0, 0, 1, 1], [], []>} : vector<16x56xf32>, vector<56x128xf32>, vector<16x128xf32> -> vector<16x128xf32>
    %c0_3 = arith.constant 0 : index
    %c0_4 = arith.constant 0 : index
    %3 = vector.load %arg3[%c0_3, %c0_4] : memref<1x128xf32, #tpu.memory_space<vmem>>, vector<1x128xf32>
    %4 = vector.broadcast %3 : vector<1x128xf32> to vector<16x128xf32>
    %5 = arith.addf %2, %4 : vector<16x128xf32>
    %cst_5 = arith.constant 0.000000e+00 : f32
    %6 = vector.broadcast %cst_5 : f32 to vector<16x128xf32>
    %7 = arith.maximumf %5, %6 : vector<16x128xf32>
    %c0_6 = arith.constant 0 : index
    %c0_7 = arith.constant 0 : index
    %8 = vector.load %arg4[%c0_6, %c0_7] : memref<128x8xf32, #tpu.memory_space<vmem>>, vector<128x8xf32>
    %cst_8 = arith.constant dense<0.000000e+00> : vector<16x8xf32>
    %9 = tpu.matmul %7, %8, %cst_8 {dimension_numbers = #tpu.dot_dimension_numbers<[1], [0], [0], [1], [0, 0, 1, 1], [], []>} : vector<16x128xf32>, vector<128x8xf32>, vector<16x8xf32> -> vector<16x8xf32>
    %c0_9 = arith.constant 0 : index
    %c0_10 = arith.constant 0 : index
    %10 = vector.load %arg5[%c0_9, %c0_10] : memref<1x8xf32, #tpu.memory_space<vmem>>, vector<1x8xf32>
    %11 = vector.broadcast %10 : vector<1x8xf32> to vector<16x8xf32>
    %12 = arith.addf %9, %11 : vector<16x8xf32>
    %c0_11 = arith.constant 0 : index
    %c0_12 = arith.constant 0 : index
    %13 = vector.load %arg6[%c0_11, %c0_12] : memref<16x8xf32, #tpu.memory_space<vmem>>, vector<16x8xf32>
    tpu.vector_store %arg6[%c0_11, %c0_12], %12 {strides = array<i32>} : memref<16x8xf32, #tpu.memory_space<vmem>>, vector<16x8xf32>,
    return
  }
  func.func @transform_0(%arg0: i32) -> (i32, i32) {
    %c0_i32 = arith.constant 0 : i32
    %c0_i32_0 = arith.constant 0 : i32
    return %arg0, %c0_i32 : i32, i32
  }
  func.func @transform_1(%arg0: i32) -> (i32, i32) {
    %c0_i32 = arith.constant 0 : i32
    %c0_i32_0 = arith.constant 0 : i32
    %c0_i32_1 = arith.constant 0 : i32
    return %c0_i32, %c0_i32_0 : i32, i32
  }
  func.func @transform_2(%arg0: i32) -> (i32, i32) {
    %c0_i32 = arith.constant 0 : i32
    %c0_i32_0 = arith.constant 0 : i32
    %c0_i32_1 = arith.constant 0 : i32
    return %c0_i32, %c0_i32_0 : i32, i32
  }
  func.func @transform_3(%arg0: i32) -> (i32, i32) {
    %c0_i32 = arith.constant 0 : i32
    %c0_i32_0 = arith.constant 0 : i32
    %c0_i32_1 = arith.constant 0 : i32
    return %c0_i32, %c0_i32_0 : i32, i32
  }
  func.func @transform_4(%arg0: i32) -> (i32, i32) {
    %c0_i32 = arith.constant 0 : i32
    %c0_i32_0 = arith.constant 0 : i32
    %c0_i32_1 = arith.constant 0 : i32
    return %c0_i32, %c0_i32_0 : i32, i32
  }
  func.func @transform_5(%arg0: i32) -> (i32, i32) {
    %c0_i32 = arith.constant 0 : i32
    %c0_i32_0 = arith.constant 0 : i32
    return %arg0, %c0_i32 : i32, i32
  }
}

</mosaic_0001>

<bundles_post_ra>
// kernel: tpu_custom_call.1
= control target key start
LH: loop header
LB: loop body
LE: loop exit
PB: predicated region body
PF: predicated region fallthrough
CT: control target
= control target key end

     0   :  { %vm33_vm0 = vcmask 457728   ;;  %vm108_vm1 = vcmask 64512   ;;  %s254_s1 = inlined_call_operand.vmem [shape: f32[56,128], index: 1, kind: input, shape index: {}]   ;;  %s255_s3 = inlined_call_operand.vmem [shape: f32[128,8], index: 3, kind: input, shape index: {}]   ;;  %s256_s2 = inlined_call_operand.vmem [shape: f32[1,128], index: 2, kind: input, shape index: {}]   ;;  %s257_s0 = inlined_call_operand.vmem [shape: f32[16,56], index: 0, kind: input, shape index: {}]   ;;  %s258_s4 = inlined_call_operand.vmem [shape: f32[1,8], index: 4, kind: input, shape index: {}]   ;;  %s259_s5 = inlined_call_operand.vmem [shape: f32[16,8], index: 5, kind: output, shape index: {}]  }
   0x1   :  { %v28_v0 = vld [vmem:[%s254_s1 + $0x30] sm:$0xff]  ;;  %v27_v1 = vld [vmem:[%s254_s1 + $0x28] sm:$0xff]  ;;  %v26_v2 = vld [vmem:[%s254_s1 + $0x20] sm:$0xff] }
   0x2   :  { %49 = vmatpush.msra.mxu0 %v28_v0  ;;  %v80_v3 = vld [vmem:[%s255_s3 + $0x78] sm:$0xff]  ;;  %v79_v4 = vld [vmem:[%s255_s3 + $0x70] sm:$0xff]  ;;  %v78_v6 = vld [vmem:[%s255_s3 + $0x68] sm:$0xff] }
   0x3   :  { %v25_v5 = vld [vmem:[%s254_s1 + $0x18] sm:$0xff]  ;;  %85 = vmatpush.msra.mxu1 %v80_v3  ;;  %117 = vmatpush.msra.mxu2 %v80_v3  ;;  %v24_v7 = vld [vmem:[%s254_s1 + $0x10] sm:$0xff]  ;;  %v77_v8 = vld [vmem:[%s255_s3 + $0x60] sm:$0xff] }
   0x4   :  { %50 = vmatpush.msra.mxu0 %v27_v1  ;;  %v23_v9 = vld [vmem:[%s254_s1 + $0x8] sm:$0xff]  ;;  %v76_v10 = vld [vmem:[%s255_s3 + $0x58] sm:$0xff]  ;;  %v22_v11 = vld [vmem:[%s254_s1] sm:$0xff] }
   0x5   :  { %86 = vmatpush.msra.mxu1 %v79_v4  ;;  %118 = vmatpush.msra.mxu2 %v79_v4  ;;  %v20_v12 = vld [vmem:[%s257_s0] sm:$0xff]  ;;  %v75_v13 = vld [vmem:[%s255_s3 + $0x50] sm:$0xff]  ;;  %v74_v14 = vld [vmem:[%s255_s3 + $0x48] sm:$0xff] }
   0x6   :  { %51 = vmatpush.msra.mxu0 %v26_v2  ;;  %v73_v15 = vld [vmem:[%s255_s3 + $0x40] sm:$0xff]  ;;  %v72_v16 = vld [vmem:[%s255_s3 + $0x38] sm:$0xff]  ;;  %v21_v17 = vld [vmem:[%s257_s0 + $0x8] sm:$0xff] }
   0x7   :  { %87 = vmatpush.msra.mxu1 %v78_v6  ;;  %119 = vmatpush.msra.mxu2 %v78_v6  ;;  %v71_v18 = vld [vmem:[%s255_s3 + $0x30] sm:$0xff]  ;;  %v70_v19 = vld [vmem:[%s255_s3 + $0x28] sm:$0xff]  ;;  %v69_v20 = vld [vmem:[%s255_s3 + $0x20] sm:$0xff] }
   0x8   :  { %52 = vmatpush.msra.mxu0 %v25_v5  ;;  %v68_v21 = vld [vmem:[%s255_s3 + $0x18] sm:$0xff]  ;;  %v67_v22 = vld [vmem:[%s255_s3 + $0x10] sm:$0xff]  ;;  %v66_v23 = vld [vmem:[%s255_s3 + $0x8] sm:$0xff] }
   0x9   :  { %88 = vmatpush.msra.mxu1 %v77_v8  ;;  %120 = vmatpush.msra.mxu2 %v77_v8  ;;  %v65_v24 = vld [vmem:[%s255_s3] sm:$0xff] }
   0xa   :  { %53 = vmatpush.msra.mxu0 %v24_v7  ;;  %v133_v25 = vld [vmem:[%s256_s2] ss:$0 sm:$0xff] }
   0xb   :  { %89 = vmatpush.msra.mxu1 %v76_v10  ;;  %121 = vmatpush.msra.mxu2 %v76_v10  ;;  %v134_v32 = vld [vmem:[%s258_s4] ss:$0 sm:$0xff] }
   0xc   :  { %54 = vmatpush.msra.mxu0 %v23_v9 }
   0xd   :  { %90 = vmatpush.msra.mxu1 %v75_v13  ;;  %122 = vmatpush.msra.mxu2 %v75_v13 }
   0xe   :  { %55 = vmatpush.msra.mxu0 %v22_v11 }
   0xf   :  { %115 = vmatmul.msk.f32.vlgmr.msra.gmra.mxu0 %vm33_vm0, %v20_v12  ;;  %91 = vmatpush.msra.mxu1 %v74_v14 }
  0x10   :  { %123 = vmatpush.msra.mxu2 %v74_v14 }
  0x11   :  { %92 = vmatpush.msra.mxu1 %v73_v15 }
  0x12   :  { %124 = vmatpush.msra.mxu2 %v73_v15 }
  0x13   :  { %93 = vmatpush.msra.mxu1 %v72_v16 }
  0x14   :  { %125 = vmatpush.msra.mxu2 %v72_v16 }
  0x15   :  { %94 = vmatpush.msra.mxu1 %v71_v18 }
  0x16   :  { %126 = vmatpush.msra.mxu2 %v71_v18 }
  0x17   :  { %116 = vmatmul.msk.f32.gmra.mxu0 %vm33_vm0, %v21_v17  ;;  %95 = vmatpush.msra.mxu1 %v70_v19 }
  0x18   :  { %127 = vmatpush.msra.mxu2 %v70_v19 }
  0x19   :  { %96 = vmatpush.msra.mxu1 %v69_v20 }
  0x1a   :  { %128 = vmatpush.msra.mxu2 %v69_v20 }
  0x1b   :  { %97 = vmatpush.msra.mxu1 %v68_v21 }
  0x1c   :  { %129 = vmatpush.msra.mxu2 %v68_v21 }
  0x1d   :  { %98 = vmatpush.msra.mxu1 %v67_v22 }
  0x1e   :  { %130 = vmatpush.msra.mxu2 %v67_v22 }
  0x1f   :  { %99 = vmatpush.msra.mxu1 %v66_v23 }
  0x20   :  { %131 = vmatpush.msra.mxu2 %v66_v23 }
  0x21   :  { %100 = vmatpush.msra.mxu1 %v65_v24 }
  0x22   :  { %132 = vmatpush.msra.mxu2 %v65_v24 }
  0x8c   :  { %v57_v26 = vpop.f32.mrf.mxu0 }
  0x8d   :  { %v58_v27 = vadd.f32 %v133_v25, %v57_v26 }
  0x8f   :  { %v63_v28 = vmax.f32 %v58_v27, 0.0 }
  0x91   :  { %101 = vmatmul.f32.vlgmr.msra.gmra.mxu1 %v63_v28 }
  0x94   :  { %v60_v29 = vpop.f32.mrf.mxu0 }
  0x95   :  { %v61_v30 = vadd.f32 %v133_v25, %v60_v29 }
  0x97   :  { %v64_v31 = vmax.f32 %v61_v30, 0.0 }
  0x99   :  { %104 = vmatmul.f32.vlgmr.msra.gmra.mxu2 %v64_v31 }
 0x10e   :  { %v102_v33 = vpop.f32.mrf.mxu1 }
 0x10f   :  { %v103_v34 = vadd.f32 %v134_v32, %v102_v33 }
 0x111   :  { %109 = vst.msk [vmem:[%s259_s5] sm:$0xff] %vm108_vm1, %v103_v34 }
 0x11c   :  { %v105_v35 = vpop.f32.mrf.mxu2 }
 0x11d   :  { %v106_v36 = vadd.f32 %v134_v32, %v105_v35 }
 0x11f   :  { %110 = vst.msk [vmem:[%s259_s5 + $0x8] sm:$0xff] %vm108_vm1, %v106_v36 }

// kernel: tpu_custom_call.1
= control target key start
LH: loop header
LB: loop body
LE: loop exit
PB: predicated region body
PF: predicated region fallthrough
CT: control target
= control target key end

     0   :  { %vm33_vm0 = vcmask 457728   ;;  %vm108_vm1 = vcmask 64512   ;;  %s254_s1 = inlined_call_operand.vmem [shape: f32[56,128], index: 1, kind: input, shape index: {}]   ;;  %s255_s3 = inlined_call_operand.vmem [shape: f32[128,8], index: 3, kind: input, shape index: {}]   ;;  %s256_s2 = inlined_call_operand.vmem [shape: f32[1,128], index: 2, kind: input, shape index: {}]   ;;  %s257_s0 = inlined_call_operand.vmem [shape: f32[16,56], index: 0, kind: input, shape index: {}]   ;;  %s258_s4 = inlined_call_operand.vmem [shape: f32[1,8], index: 4, kind: input, shape index: {}]   ;;  %s259_s5 = inlined_call_operand.vmem [shape: f32[16,8], index: 5, kind: output, shape index: {}]  }
   0x1   :  { %v28_v0 = vld [vmem:[%s254_s1 + $0x30] sm:$0xff]  ;;  %v27_v1 = vld [vmem:[%s254_s1 + $0x28] sm:$0xff]  ;;  %v26_v2 = vld [vmem:[%s254_s1 + $0x20] sm:$0xff] }
   0x2   :  { %49 = vmatpush.msra.mxu0 %v28_v0  ;;  %v80_v3 = vld [vmem:[%s255_s3 + $0x78] sm:$0xff]  ;;  %v79_v4 = vld [vmem:[%s255_s3 + $0x70] sm:$0xff]  ;;  %v78_v6 = vld [vmem:[%s255_s3 + $0x68] sm:$0xff] }
   0x3   :  { %v25_v5 = vld [vmem:[%s254_s1 + $0x18] sm:$0xff]  ;;  %85 = vmatpush.msra.mxu1 %v80_v3  ;;  %117 = vmatpush.msra.mxu2 %v80_v3  ;;  %v24_v7 = vld [vmem:[%s254_s1 + $0x10] sm:$0xff]  ;;  %v77_v8 = vld [vmem:[%s255_s3 + $0x60] sm:$0xff] }
   0x4   :  { %50 = vmatpush.msra.mxu0 %v27_v1  ;;  %v23_v9 = vld [vmem:[%s254_s1 + $0x8] sm:$0xff]  ;;  %v76_v10 = vld [vmem:[%s255_s3 + $0x58] sm:$0xff]  ;;  %v22_v11 = vld [vmem:[%s254_s1] sm:$0xff] }
   0x5   :  { %86 = vmatpush.msra.mxu1 %v79_v4  ;;  %118 = vmatpush.msra.mxu2 %v79_v4  ;;  %v20_v12 = vld [vmem:[%s257_s0] sm:$0xff]  ;;  %v75_v13 = vld [vmem:[%s255_s3 + $0x50] sm:$0xff]  ;;  %v74_v14 = vld [vmem:[%s255_s3 + $0x48] sm:$0xff] }
   0x6   :  { %51 = vmatpush.msra.mxu0 %v26_v2  ;;  %v73_v15 = vld [vmem:[%s255_s3 + $0x40] sm:$0xff]  ;;  %v72_v16 = vld [vmem:[%s255_s3 + $0x38] sm:$0xff]  ;;  %v21_v17 = vld [vmem:[%s257_s0 + $0x8] sm:$0xff] }
   0x7   :  { %87 = vmatpush.msra.mxu1 %v78_v6  ;;  %119 = vmatpush.msra.mxu2 %v78_v6  ;;  %v71_v18 = vld [vmem:[%s255_s3 + $0x30] sm:$0xff]  ;;  %v70_v19 = vld [vmem:[%s255_s3 + $0x28] sm:$0xff]  ;;  %v69_v20 = vld [vmem:[%s255_s3 + $0x20] sm:$0xff] }
   0x8   :  { %52 = vmatpush.msra.mxu0 %v25_v5  ;;  %v68_v21 = vld [vmem:[%s255_s3 + $0x18] sm:$0xff]  ;;  %v67_v22 = vld [vmem:[%s255_s3 + $0x10] sm:$0xff]  ;;  %v66_v23 = vld [vmem:[%s255_s3 + $0x8] sm:$0xff] }
   0x9   :  { %88 = vmatpush.msra.mxu1 %v77_v8  ;;  %120 = vmatpush.msra.mxu2 %v77_v8  ;;  %v65_v24 = vld [vmem:[%s255_s3] sm:$0xff] }
   0xa   :  { %53 = vmatpush.msra.mxu0 %v24_v7  ;;  %v133_v25 = vld [vmem:[%s256_s2] ss:$0 sm:$0xff] }
   0xb   :  { %89 = vmatpush.msra.mxu1 %v76_v10  ;;  %121 = vmatpush.msra.mxu2 %v76_v10  ;;  %v134_v32 = vld [vmem:[%s258_s4] ss:$0 sm:$0xff] }
   0xc   :  { %54 = vmatpush.msra.mxu0 %v23_v9 }
   0xd   :  { %90 = vmatpush.msra.mxu1 %v75_v13  ;;  %122 = vmatpush.msra.mxu2 %v75_v13 }
   0xe   :  { %55 = vmatpush.msra.mxu0 %v22_v11 }
   0xf   :  { %115 = vmatmul.msk.f32.vlgmr.msra.gmra.mxu0 %vm33_vm0, %v20_v12  ;;  %91 = vmatpush.msra.mxu1 %v74_v14 }
  0x10   :  { %123 = vmatpush.msra.mxu2 %v74_v14 }
  0x11   :  { %92 = vmatpush.msra.mxu1 %v73_v15 }
  0x12   :  { %124 = vmatpush.msra.mxu2 %v73_v15 }
  0x13   :  { %93 = vmatpush.msra.mxu1 %v72_v16 }
  0x14   :  { %125 = vmatpush.msra.mxu2 %v72_v16 }
  0x15   :  { %94 = vmatpush.msra.mxu1 %v71_v18 }
  0x16   :  { %126 = vmatpush.msra.mxu2 %v71_v18 }
  0x17   :  { %116 = vmatmul.msk.f32.gmra.mxu0 %vm33_vm0, %v21_v17  ;;  %95 = vmatpush.msra.mxu1 %v70_v19 }
  0x18   :  { %127 = vmatpush.msra.mxu2 %v70_v19 }
  0x19   :  { %96 = vmatpush.msra.mxu1 %v69_v20 }
  0x1a   :  { %128 = vmatpush.msra.mxu2 %v69_v20 }
  0x1b   :  { %97 = vmatpush.msra.mxu1 %v68_v21 }
  0x1c   :  { %129 = vmatpush.msra.mxu2 %v68_v21 }
  0x1d   :  { %98 = vmatpush.msra.mxu1 %v67_v22 }
  0x1e   :  { %130 = vmatpush.msra.mxu2 %v67_v22 }
  0x1f   :  { %99 = vmatpush.msra.mxu1 %v66_v23 }
  0x20   :  { %131 = vmatpush.msra.mxu2 %v66_v23 }
  0x21   :  { %100 = vmatpush.msra.mxu1 %v65_v24 }
  0x22   :  { %132 = vmatpush.msra.mxu2 %v65_v24 }
  0x8c   :  { %v57_v26 = vpop.f32.mrf.mxu0 }
  0x8d   :  { %v58_v27 = vadd.f32 %v133_v25, %v57_v26 }
  0x8f   :  { %v63_v28 = vmax.f32 %v58_v27, 0.0 }
  0x91   :  { %101 = vmatmul.f32.vlgmr.msra.gmra.mxu1 %v63_v28 }
  0x94   :  { %v60_v29 = vpop.f32.mrf.mxu0 }
  0x95   :  { %v61_v30 = vadd.f32 %v133_v25, %v60_v29 }
  0x97   :  { %v64_v31 = vmax.f32 %v61_v30, 0.0 }
  0x99   :  { %104 = vmatmul.f32.vlgmr.msra.gmra.mxu2 %v64_v31 }
 0x10e   :  { %v102_v33 = vpop.f32.mrf.mxu1 }
 0x10f   :  { %v103_v34 = vadd.f32 %v134_v32, %v102_v33 }
 0x111   :  { %109 = vst.msk [vmem:[%s259_s5] sm:$0xff] %vm108_vm1, %v103_v34 }
 0x11c   :  { %v105_v35 = vpop.f32.mrf.mxu2 }
 0x11d   :  { %v106_v36 = vadd.f32 %v134_v32, %v105_v35 }
 0x11f   :  { %110 = vst.msk [vmem:[%s259_s5 + $0x8] sm:$0xff] %vm108_vm1, %v106_v36 }

</bundles_post_ra>
